<compile_context>
chip_gen: v5e
topology: v5e:2x2
jax: 0.10.0
libtpu: 0.0.40
codegen_flags: <defaults>
</compile_context>

<pallas_src>
import functools

import jax
import jax.numpy as jnp
from jax import lax
from jax.experimental import pallas as pl
from jax.experimental.pallas import tpu as pltpu


_VMEM_LIMIT = 64 * 1024 * 1024
_STATE_MINOR = 128            # lane-replicated online-softmax state width


# --------------------------------- tiling helper ----------------------------------------

def _pick_tile(dim, target, multiple):
    """Largest tile <= target that divides `dim` and is a multiple of `multiple`.
    Falls back to the full dim (block == full array dim is always legal)."""
    if dim <= target:
        return dim
    t = (target // multiple) * multiple
    while t >= multiple:
        if dim % t == 0:
            return t
        t -= multiple
    return dim


# ------------------------- tiled linear kernels (matmul [+ bias]) ------------------------

def _matmul_kernel(x_ref, w_ref, o_ref, acc_ref):
    @pl.when(pl.program_id(2) == 0)
    def _():
        acc_ref[...] = jnp.zeros_like(acc_ref)

    acc_ref[...] += jnp.dot(x_ref[...], w_ref[...], preferred_element_type=jnp.float32)

    @pl.when(pl.program_id(2) == pl.num_programs(2) - 1)
    def _():
        o_ref[...] = acc_ref[...].astype(o_ref.dtype)


def _matmul_bias_kernel(x_ref, w_ref, b_ref, o_ref, acc_ref):
    @pl.when(pl.program_id(2) == 0)
    def _():
        acc_ref[...] = jnp.zeros_like(acc_ref)

    acc_ref[...] += jnp.dot(x_ref[...], w_ref[...], preferred_element_type=jnp.float32)

    @pl.when(pl.program_id(2) == pl.num_programs(2) - 1)
    def _():
        o_ref[...] = (acc_ref[...] + b_ref[...].astype(jnp.float32)).astype(o_ref.dtype)


def pallas_linear(x, w, b=None, *, out_dtype=None, mxu_dtype=jnp.bfloat16,
                  tm=512, tn=512, tk=1024):
    """y = x @ w (+ b); MXU operands in `mxu_dtype`, f32 accumulation over K."""
    M, K = x.shape
    K2, N = w.shape
    assert K == K2
    out_dtype = x.dtype if out_dtype is None else out_dtype
    x = x.astype(mxu_dtype)
    w = w.astype(mxu_dtype)

    tm = _pick_tile(M, tm, 8)
    tn = _pick_tile(N, tn, 128)
    tk = _pick_tile(K, tk, 128)
    grid = (M // tm, N // tn, K // tk)

    x_spec = pl.BlockSpec((tm, tk), lambda i, j, k: (i, k))
    w_spec = pl.BlockSpec((tk, tn), lambda i, j, k: (k, j))
    o_spec = pl.BlockSpec((tm, tn), lambda i, j, k: (i, j))
    cparams = pltpu.CompilerParams(
        dimension_semantics=("parallel", "parallel", "arbitrary"),
        vmem_limit_bytes=_VMEM_LIMIT,
    )
    scratch = [pltpu.VMEM((tm, tn), jnp.float32)]

    if b is None:
        return pl.pallas_call(
            _matmul_kernel,
            out_shape=jax.ShapeDtypeStruct((M, N), out_dtype),
            grid=grid,
            in_specs=[x_spec, w_spec],
            out_specs=o_spec,
            scratch_shapes=scratch,
            compiler_params=cparams,
        )(x, w)

    b2 = b.astype(jnp.float32).reshape(1, N)
    b_spec = pl.BlockSpec((1, tn), lambda i, j, k: (0, j))
    return pl.pallas_call(
        _matmul_bias_kernel,
        out_shape=jax.ShapeDtypeStruct((M, N), out_dtype),
        grid=grid,
        in_specs=[x_spec, w_spec, b_spec],
        out_specs=o_spec,
        scratch_shapes=scratch,
        compiler_params=cparams,
    )(x, w, b2)


# -------------------- one-pass RoPE (q scaled, k) + head-major K/V repack ----------------

def _rope_repack_kernel(q_ref, k_ref, v_ref, cos_ref, sin_ref,
                        qo_ref, ko_ref, vo_ref, *,
                        num_heads, num_kv_heads, head_dim, scale):
    half = head_dim // 2
    cos = cos_ref[...]                      # (t, D) f32
    sin = sin_ref[...]                      # (t, D) f32, sign pre-folded: [-sin, sin]
    lane_aligned = (head_dim % 128 == 0)

    def rope(x):
        # neox rope: x*[c,c] + [x2,x1]*[-s,s]
        xf = x.astype(jnp.float32)
        if lane_aligned:
            rot = pltpu.roll(xf, shift=half, axis=1)      # XLU; half-rotation == [x2, x1]
        else:
            rot = jnp.concatenate([xf[:, half:], xf[:, :half]], axis=1)
        return xf * cos + rot * sin

    for h in range(num_heads):
        c0 = h * head_dim
        qo_ref[:, c0:c0 + head_dim] = (rope(q_ref[:, c0:c0 + head_dim]) * scale
                                       ).astype(qo_ref.dtype)
    for h in range(num_kv_heads):
        c0 = h * head_dim
        ko_ref[h] = rope(k_ref[:, c0:c0 + head_dim]).astype(ko_ref.dtype)
        vo_ref[h] = v_ref[:, c0:c0 + head_dim].astype(vo_ref.dtype)


# -------------------- causal GQA flash attention (online softmax) ------------------------

def _flash_attn_kernel(q_ref, k_ref, v_ref, o_ref, m_ref, l_ref, acc_ref, *,
                       group, head_dim, tq, tk, mxu_dtype):
    i = pl.program_id(1)                    # q tile
    j = pl.program_id(2)                    # kv tile (reduction axis, innermost)
    NEG = -1e30                             # finite mask value: no NaN anywhere

    @pl.when(j == 0)
    def _init():
        m_ref[...] = jnp.full_like(m_ref, NEG)
        l_ref[...] = jnp.zeros_like(l_ref)
        acc_ref[...] = jnp.zeros_like(acc_ref)

    q_first = i * tq
    q_last = q_first + tq - 1
    k_first = j * tk
    k_last = k_first + tk - 1
    needed = k_first <= q_last              # tile not entirely above the causal diagonal
    crossing = k_last > q_first             # tile needs (partial) causal masking

    def process(masked):
        k_tile = k_ref[...]                 # (tk, D) mxu_dtype
        v_tile = v_ref[...]
        if masked:
            rows = q_first + lax.broadcasted_iota(jnp.int32, (tq, tk), 0)
            cols = k_first + lax.broadcasted_iota(jnp.int32, (tq, tk), 1)
            bias = jnp.where(cols <= rows, 0.0, NEG).astype(jnp.float32)
        for g in range(group):
            qh = q_ref[:, g * head_dim:(g + 1) * head_dim]            # (tq, D), pre-roped+scaled
            s = lax.dot_general(qh, k_tile, (((1,), (1,)), ((), ())),
                                preferred_element_type=jnp.float32)    # (tq, tk)
            if masked:
                s = s + bias
            m_prev = m_ref[g]                                          # (tq, 128) lane-replicated
            l_prev = l_ref[g]
            m_next = jnp.maximum(m_prev, jnp.max(s, axis=-1, keepdims=True))
            alpha = jnp.exp(m_prev - m_next)                           # (tq, 128)
            p = jnp.exp(s - m_next[:, 0:1])                            # (tq, tk)
            l_ref[g] = alpha * l_prev + jnp.sum(p, axis=-1, keepdims=True)
            m_ref[g] = m_next
            pv = jnp.dot(p.astype(mxu_dtype), v_tile,
                         preferred_element_type=jnp.float32)           # (tq, D)
            acc_ref[g] = acc_ref[g] * alpha[:, 0:1] + pv

    @pl.when(needed & crossing)             # diagonal-crossing tile: apply causal bias
    def _():
        process(True)

    @pl.when(needed & jnp.logical_not(crossing))   # interior tile: mask-free fast path
    def _():
        process(False)

    @pl.when(j == pl.num_programs(2) - 1)
    def _finalize():
        for g in range(group):
            inv = pl.reciprocal(l_ref[g][:, 0:1], approx=True)         # EUP slot
            o_ref[:, g * head_dim:(g + 1) * head_dim] = (
                acc_ref[g] * inv).astype(o_ref.dtype)


# ------------------------------------- module wrapper ------------------------------------

def qwen2_attention(positions, hidden_states, wqkv, bqkv, wo,
                    num_heads, num_kv_heads, head_dim, rope_theta=10000.0,
                    tq=256, tkv=512, mxu_dtype=jnp.bfloat16):
    S, H = hidden_states.shape
    assert num_heads % num_kv_heads == 0
    group = num_heads // num_kv_heads
    q_size = num_heads * head_dim
    kv_size = num_kv_heads * head_dim
    scaling = head_dim ** -0.5
    out_dtype = hidden_states.dtype

    assert head_dim % 2 == 0
    assert q_size % 128 == 0, "num_heads*head_dim must be a multiple of 128"
    assert kv_size % 128 == 0, "num_kv_heads*head_dim must be a multiple of 128"
    # TODO(synk): configs with (group*head_dim) % 128 != 0 (e.g. Qwen2-0.5B) need a
    #             3-D (num_kv_heads, S, group*head_dim) attention output + transpose.
    assert (group * head_dim) % 128 == 0, "group*head_dim must be a multiple of 128"

    # Pad S so the tile pickers never fall back to a full-length (VMEM-busting) tile.
    align = 128 if S >= 128 else 8
    S_pad = ((S + align - 1) // align) * align
    if S_pad != S:
        pad = S_pad - S
        hidden_states = jnp.pad(hidden_states, ((0, pad), (0, 0)))
        positions = jnp.concatenate(
            [positions, positions[-1] + 1 + jnp.arange(pad, dtype=positions.dtype)])

    # 1) fused QKV projection (tiled matmul + bias), bf16 output for the MXU.
    qkv = pallas_linear(hidden_states, wqkv, bqkv,
                        out_dtype=mxu_dtype, mxu_dtype=mxu_dtype)

    # 2) rotary tables (tiny glue): neox layout, rotation sign folded into sin table.
    half = head_dim // 2
    inv_freq = 1.0 / (rope_theta ** (jnp.arange(half, dtype=jnp.float32) * 2.0 / head_dim))
    freqs = positions.astype(jnp.float32)[:, None] * inv_freq[None, :]       # (S_pad, half)
    cos = jnp.cos(freqs)
    sin = jnp.sin(freqs)
    cos_full = jnp.concatenate([cos, cos], axis=-1)                          # (S_pad, D)
    sin_signed = jnp.concatenate([-sin, sin], axis=-1)                       # (S_pad, D)

    # 3) one-pass rope + repack: roped+scaled Q (lane-dense, (S, q_size)), roped K and
    #    V repacked head-major (num_kv_heads, S, head_dim).  Rope happens exactly once
    #    per token, never inside the attention kv loop.  Q/K/V are read straight out of
    #    the fused qkv activation via column-offset BlockSpecs (no split/transpose).
    trope = _pick_tile(S_pad, 256, 8)
    rope_kernel = functools.partial(
        _rope_repack_kernel, num_heads=num_heads, num_kv_heads=num_kv_heads,
        head_dim=head_dim, scale=scaling)
    q_roped, k_roped, v_heads = pl.pallas_call(
        rope_kernel,
        out_shape=(
            jax.ShapeDtypeStruct((S_pad, q_size), mxu_dtype),
            jax.ShapeDtypeStruct((num_kv_heads, S_pad, head_dim), mxu_dtype),
            jax.ShapeDtypeStruct((num_kv_heads, S_pad, head_dim), mxu_dtype),
        ),
        grid=(S_pad // trope,),
        in_specs=[
            pl.BlockSpec((trope, q_size), lambda i: (i, 0)),             # q columns
            pl.BlockSpec((trope, kv_size), lambda i: (i, group)),        # k columns
            pl.BlockSpec((trope, kv_size), lambda i: (i, group + 1)),    # v columns
            pl.BlockSpec((trope, head_dim), lambda i: (i, 0)),           # cos
            pl.BlockSpec((trope, head_dim), lambda i: (i, 0)),           # sin (signed)
        ],
        out_specs=[
            pl.BlockSpec((trope, q_size), lambda i: (i, 0)),
            pl.BlockSpec((num_kv_heads, trope, head_dim), lambda i: (0, i, 0)),
            pl.BlockSpec((num_kv_heads, trope, head_dim), lambda i: (0, i, 0)),
        ],
        compiler_params=pltpu.CompilerParams(
            dimension_semantics=("parallel",), vmem_limit_bytes=_VMEM_LIMIT),
    )(qkv, qkv, qkv, cos_full, sin_signed)

    # 4) flash attention: grid = (kv_head, q_tile, kv_tile), kv reduction innermost.
    mult = 128 if S_pad % 128 == 0 else 8
    tq = _pick_tile(S_pad, tq, mult)
    tkv = _pick_tile(S_pad, tkv, mult)
    nq, nkv = S_pad // tq, S_pad // tkv

    def kv_index(h, i, j):
        # Clamp the kv block index: fully-masked (above-diagonal) steps reuse the
        # previously fetched block, so their K/V HBM DMA is elided.
        return (h, jnp.minimum(j, (i * tq + tq - 1) // tkv), 0)

    attn_kernel = functools.partial(
        _flash_attn_kernel, group=group, head_dim=head_dim,
        tq=tq, tk=tkv, mxu_dtype=mxu_dtype)

    attn = pl.pallas_call(
        attn_kernel,
        out_shape=jax.ShapeDtypeStruct((S_pad, q_size), mxu_dtype),
        grid=(num_kv_heads, nq, nkv),
        in_specs=[
            pl.BlockSpec((tq, group * head_dim), lambda h, i, j: (i, h)),   # q group
            pl.BlockSpec((None, tkv, head_dim), kv_index),                  # k (head-major)
            pl.BlockSpec((None, tkv, head_dim), kv_index),                  # v (head-major)
        ],
        out_specs=pl.BlockSpec((tq, group * head_dim), lambda h, i, j: (i, h)),
        scratch_shapes=[
            pltpu.VMEM((group, tq, _STATE_MINOR), jnp.float32),   # running max m
            pltpu.VMEM((group, tq, _STATE_MINOR), jnp.float32),   # running sum l
            pltpu.VMEM((group, tq, head_dim), jnp.float32),       # output accumulator
        ],
        compiler_params=pltpu.CompilerParams(
            dimension_semantics=("parallel", "parallel", "arbitrary"),
            vmem_limit_bytes=_VMEM_LIMIT),
    )(q_roped, k_roped, v_heads)

    # 5) output projection (bias-free RowParallelLinear), back to the activation dtype.
    out = pallas_linear(attn, wo, out_dtype=out_dtype, mxu_dtype=mxu_dtype)
    return out[:S]


# --------------------------------- pure-JAX reference ------------------------------------

def ref_qwen2_attention(positions, x, wqkv, bqkv, wo,
                        num_heads, num_kv_heads, head_dim, rope_theta=10000.0):
    S, H = x.shape
    q_size = num_heads * head_dim
    kv_size = num_kv_heads * head_dim
    qkv = x @ wqkv + bqkv
    q, k, v = jnp.split(qkv, [q_size, q_size + kv_size], axis=-1)
    qh = q.reshape(S, num_heads, head_dim)
    kh = k.reshape(S, num_kv_heads, head_dim)
    vh = v.reshape(S, num_kv_heads, head_dim)

    half = head_dim // 2
    inv_freq = 1.0 / (rope_theta ** (jnp.arange(half, dtype=jnp.float32) * 2.0 / head_dim))
    freqs = positions.astype(jnp.float32)[:, None] * inv_freq[None, :]
    cos = jnp.cos(freqs)[:, None, :]
    sin = jnp.sin(freqs)[:, None, :]

    def rope(t):
        t1, t2 = t[..., :half], t[..., half:]
        return jnp.concatenate([t1 * cos - t2 * sin, t2 * cos + t1 * sin], axis=-1)

    qh, kh = rope(qh), rope(kh)
    group = num_heads // num_kv_heads
    kh = jnp.repeat(kh, group, axis=1)
    vh = jnp.repeat(vh, group, axis=1)

    s = jnp.einsum('qhd,khd->hqk', qh, kh) * head_dim ** -0.5
    mask = jnp.tril(jnp.ones((S, S), dtype=bool))
    s = jnp.where(mask[None], s, -jnp.inf)
    p = jax.nn.softmax(s, axis=-1)
    o = jnp.einsum('hqk,khd->qhd', p, vh).reshape(S, q_size)
    return o @ wo


# --------------------------------------- main --------------------------------------------

if __name__ == "__main__":
    # small Qwen2-like config (head_dim=128 like the real 7B/72B models)
    seq = 8
    num_heads = 4
    num_kv_heads = 2
    head_dim = 128
    hidden_size = num_heads * head_dim            # 512
    q_size = num_heads * head_dim
    kv_size = num_kv_heads * head_dim
    qkv_out = q_size + 2 * kv_size                # 1024

    key = jax.random.PRNGKey(0)
    k1, k2, k3, k4 = jax.random.split(key, 4)

    hidden_states = jax.random.normal(k1, (seq, hidden_size), dtype=jnp.float32)
    positions = jnp.arange(seq, dtype=jnp.int32)

    # deterministic synthetic parameters ([in, out] layout; equals x @ W^T of nn.Linear)
    wqkv = 0.03 * jax.random.normal(k2, (hidden_size, qkv_out), dtype=jnp.float32)
    bqkv = 0.03 * jax.random.normal(k3, (qkv_out,), dtype=jnp.float32)
    wo = 0.03 * jax.random.normal(k4, (q_size, hidden_size), dtype=jnp.float32)

    out = qwen2_attention(positions, hidden_states, wqkv, bqkv, wo,
                          num_heads, num_kv_heads, head_dim)
    out = jax.block_until_ready(out)

    ref = ref_qwen2_attention(positions, hidden_states, wqkv, bqkv, wo,
                              num_heads, num_kv_heads, head_dim)
    assert out.shape == (seq, hidden_size)
    assert out.dtype == hidden_states.dtype
    max_err = float(jnp.max(jnp.abs(out.astype(jnp.float32) - ref)))
    # kernels use bf16 MXU operands with f32 accumulation -> ~1% expected deviation
    assert jnp.allclose(out.astype(jnp.float32), ref, rtol=3e-2, atol=3e-2), \
        f"mismatch vs pure-JAX reference (max abs err {max_err})"

    print("KERNEL_OK")
</pallas_src>

<mosaic_0001>
module attributes {stable_mosaic.version = 11 : i64} {
  func.func @_matmul_bias_kernel(%arg0: i32, %arg1: i32, %arg2: i32, %arg3: memref<8x512xbf16, #tpu.memory_space<vmem>>, %arg4: memref<512x512xbf16, #tpu.memory_space<vmem>>, %arg5: memref<1x512xf32, #tpu.memory_space<vmem>>, %arg6: memref<8x512xbf16, #tpu.memory_space<vmem>>, %arg7: memref<8x512xf32, #tpu.memory_space<vmem>>) attributes {dimension_semantics = [#tpu.dimension_semantics<parallel>, #tpu.dimension_semantics<parallel>, #tpu.dimension_semantics<arbitrary>], iteration_bounds = array<i64: 1, 2, 1>, scalar_prefetch = 0 : i64, scratch_operands = 1 : i64, tpu.core_type = #tpu.core_type<tc>, window_params = [{transform_indices = @transform_0, window_bounds = array<i64: 8, 512>}, {transform_indices = @transform_1, window_bounds = array<i64: 512, 512>}, {transform_indices = @transform_2, window_bounds = array<i64: 1, 512>}, {transform_indices = @transform_3, window_bounds = array<i64: 8, 512>}]} {
    %c0_i32 = arith.constant 0 : i32
    %0 = arith.cmpi eq, %arg2, %c0_i32 : i32
    %1 = arith.extui %0 : i1 to i32
    %c0_i32_0 = arith.constant 0 : i32
    %2 = arith.cmpi ne, %1, %c0_i32_0 : i32
    scf.if %2 {
      %cst_10 = arith.constant 0.000000e+00 : f32
      %12 = vector.broadcast %cst_10 : f32 to vector<8x512xf32>
      %c0_11 = arith.constant 0 : index
      %c0_12 = arith.constant 0 : index
      %13 = vector.load %arg7[%c0_11, %c0_12] : memref<8x512xf32, #tpu.memory_space<vmem>>, vector<8x512xf32>
      tpu.vector_store %arg7[%c0_11, %c0_12], %12 {strides = array<i32>} : memref<8x512xf32, #tpu.memory_space<vmem>>, vector<8x512xf32>,
    } else {
    }
    %c0 = arith.constant 0 : index
    %c0_1 = arith.constant 0 : index
    %3 = vector.load %arg7[%c0, %c0_1] : memref<8x512xf32, #tpu.memory_space<vmem>>, vector<8x512xf32>
    %c0_2 = arith.constant 0 : index
    %c0_3 = arith.constant 0 : index
    %4 = vector.load %arg3[%c0_2, %c0_3] : memref<8x512xbf16, #tpu.memory_space<vmem>>, vector<8x512xbf16>
    %c0_4 = arith.constant 0 : index
    %c0_5 = arith.constant 0 : index
    %5 = vector.load %arg4[%c0_4, %c0_5] : memref<512x512xbf16, #tpu.memory_space<vmem>>, vector<512x512xbf16>
    %cst = arith.constant dense<0.000000e+00> : vector<8x512xf32>
    %6 = tpu.matmul %4, %5, %cst {dimension_numbers = #tpu.dot_dimension_numbers<[1], [0], [0], [1], [0, 0, 1, 1], [], []>} : vector<8x512xbf16>, vector<512x512xbf16>, vector<8x512xf32> -> vector<8x512xf32>
    %7 = arith.addf %3, %6 : vector<8x512xf32>
    %c0_6 = arith.constant 0 : index
    %c0_7 = arith.constant 0 : index
    %8 = vector.load %arg7[%c0_6, %c0_7] : memref<8x512xf32, #tpu.memory_space<vmem>>, vector<8x512xf32>
    tpu.vector_store %arg7[%c0_6, %c0_7], %7 {strides = array<i32>} : memref<8x512xf32, #tpu.memory_space<vmem>>, vector<8x512xf32>,
    %c0_i32_8 = arith.constant 0 : i32
    %9 = arith.cmpi eq, %arg2, %c0_i32_8 : i32
    %10 = arith.extui %9 : i1 to i32
    %c0_i32_9 = arith.constant 0 : i32
    %11 = arith.cmpi ne, %10, %c0_i32_9 : i32
    scf.if %11 {
      %c0_10 = arith.constant 0 : index
      %c0_11 = arith.constant 0 : index
      %12 = vector.load %arg7[%c0_10, %c0_11] : memref<8x512xf32, #tpu.memory_space<vmem>>, vector<8x512xf32>
      %c0_12 = arith.constant 0 : index
      %c0_13 = arith.constant 0 : index
      %13 = vector.load %arg5[%c0_12, %c0_13] : memref<1x512xf32, #tpu.memory_space<vmem>>, vector<1x512xf32>
      %14 = vector.broadcast %13 : vector<1x512xf32> to vector<8x512xf32>
      %15 = arith.addf %12, %14 : vector<8x512xf32>
      %16 = arith.truncf %15 : vector<8x512xf32> to vector<8x512xbf16>
      %c0_14 = arith.constant 0 : index
      %c0_15 = arith.constant 0 : index
      %17 = vector.load %arg6[%c0_14, %c0_15] : memref<8x512xbf16, #tpu.memory_space<vmem>>, vector<8x512xbf16>
      tpu.vector_store %arg6[%c0_14, %c0_15], %16 {strides = array<i32>} : memref<8x512xbf16, #tpu.memory_space<vmem>>, vector<8x512xbf16>,
    } else {
    }
    return
  }
  func.func @transform_0(%arg0: i32, %arg1: i32, %arg2: i32) -> (i32, i32) {
    %c0_i32 = arith.constant 0 : i32
    return %arg0, %arg2 : i32, i32
  }
  func.func @transform_1(%arg0: i32, %arg1: i32, %arg2: i32) -> (i32, i32) {
    %c0_i32 = arith.constant 0 : i32
    return %arg2, %arg1 : i32, i32
  }
  func.func @transform_2(%arg0: i32, %arg1: i32, %arg2: i32) -> (i32, i32) {
    %c0_i32 = arith.constant 0 : i32
    %c0_i32_0 = arith.constant 0 : i32
    return %c0_i32, %arg1 : i32, i32
  }
  func.func @transform_3(%arg0: i32, %arg1: i32, %arg2: i32) -> (i32, i32) {
    %c0_i32 = arith.constant 0 : i32
    return %arg0, %arg1 : i32, i32
  }
}

</mosaic_0001>

<bundles_post_ra>
// kernel: tpu_custom_call.1
= control target key start
LH: loop header
LB: loop body
LE: loop exit
PB: predicated region body
PF: predicated region fallthrough
CT: control target
= control target key end

     0   :  { %8 = vsyncpa [#allocation4], 0  ;;  %s2871_s0 = inlined_call_operand.hbm [shape: bf16[8,512], index: 0, kind: input, shape index: {}]   ;;  %s2872_s1 = inlined_call_operand.hbm [shape: bf16[512,1024], index: 1, kind: input, shape index: {}]   ;;  %s2873_s2 = inlined_call_operand.hbm [shape: f32[1,1024], index: 2, kind: input, shape index: {}]   ;;  %s2874_s3 = inlined_call_operand.hbm [shape: bf16[8,1024], index: 3, kind: output, shape index: {}]  }
   0x1   :  { %9 = vsyncpa [#allocation7], 0 }
   0x2   :  { %11 = vsyncpa [#allocation7 + $0x1], 0 }
   0x3   :  { %12 = vsyncpa [#allocation5], 0 }
   0x4   :  { %14 = vsyncpa [#allocation5 + $0x1], 0  ;;  %s2410_s12 = smov 0   ;;  %s2412_s13 = smov 0  }
   0x5   :  { %s2414_s14 = smov 0   ;;  %s2416_s15 = smov 0  }
   0x6   :  { %s2418_s16 = smov 0   ;;  %s2420_s17 = smov 0  }
   0x7 LB: > { %s35_s18 = sadd.s32 1, %s2380_s16  ;;  %s76_s19 = sadd.s32 1, %s2372_s14  ;;  %s2384_s17 = sphi %s2420_s17, %s20_s17   ;;  %s2380_s16 = sphi %s2418_s16, %s2885_s16   ;;  %s2376_s15 = sphi %s2416_s15, %s2884_s15   ;;  %s2372_s14 = sphi %s2414_s14, %s2883_s14   ;;  %s2368_s13 = sphi %s2412_s13, %s2882_s13   ;;  %s2364_s12 = sphi %s2410_s12, %s2881_s12  }
   0x8   : > { %p37_p0 = scmp.ge.s32.totalorder %s35_s18, 2  ;;  %p83_p1 = scmp.ne.s32.totalorder %s2372_s14, %s2368_s13 }
   0x9   : > { %p84_p2 = scmp.eq.s32.totalorder %s2384_s17, 0  ;;  %p1469_p3 = scmp.ge.s32.totalorder %s2384_s17, 2 }
   0xa   : > { %s2887_s18 = smov (%p37_p0, %s35_s18), 0  ;;  %p2153_p5 = scmp.lt.s32.totalorder %s2384_s17, 2 }
   0xb   : > { %p2451_p4 = por %p84_p2, %p83_p1  ;;  %s72_s21 = ssub.s32 %s2380_s16, %s2887_s18 }
   0xc   : > { %s184_s22 = sand.u32 1, %s2384_s17   ;;  %p74_p6 = scmp.eq.s32.totalorder %s72_s21, 0 }
   0xd   : > { %s186_s23 = sand.u32 1, %s2372_s14   ;;  %s1997_s24 = sshll.u32 %s2380_s16, 4 }
   0xe   : > { %s2462_s25 = scalar_select %p74_p6, %s2372_s14, %s76_s19  }
   0xf   : > { %s1470_s26 = sshll.u32 %s186_s23, 10  ;;  %s196_s29 = scalar_lea.hbm %s2872_s1, %s1997_s24 }
  0x10   : > { %s197_s30 = sshll.u32 %s196_s29, 4  ;;  %s188_s4 = scalar_lea.vmem [#allocation6], %s1470_s26  ;;  %s198_s30 = int_to_ptr.hbm [resolvable:$true] %s197_s30 }
  0x11   : > { %s199_s5 = sshll.u32 %s188_s4, 4  ;;  %p2473_p7 = pnand %p2153_p5, %p2451_p4  ;;  %s200_s5 = int_to_ptr.vmem [resolvable:$true] %s199_s5 }
  0x12   : > { %s2477_s7 = scalar_lea.sflag [#allocation7], %s184_s22  ;;  %s2386_s8 = smov 512  }
  0x13   : > { %s2387_s9 = smov 256   ;;  %s2388_s10 = smov 16  }
  0x14   : > { %2144 = dma.hbm_to_vmem [thread:$0]  (!%p2473_p7), %s198_s30, 16384, %s200_s5, %s2477_s7, %s2386_s8, %s2387_s9, %s2388_s10  }
  0x15   : > { %s2483_s11 = sadd.s32 4294967295, %s2384_s17   ;;  %s1466_s19 = sadd.s32 4294967294, %s2384_s17  }
  0x16   : > { %p89_p8 = scmp.ne.s32.totalorder %s2368_s13, %s2364_s12  ;;  %p90_p9 = scmp.eq.s32.totalorder %s2483_s11, 0 }
  0x17   : > { %p141_p10 = scmp.eq.s32.totalorder %s2483_s11, 1  ;;  %p147_p11 = scmp.eq.s32.totalorder %s1466_s19, 1 }
  0x18   : > { %p2492_p12 = por %p90_p9, %p89_p8  ;;  %p1467_p13 = scmp.ge.s32.totalorder %s2384_s17, 1 }
  0x19   : > { %p2500_p0 = por %p141_p10, %p83_p1  ;;  %p2504_p2 = por %p147_p11, %p89_p8 }
  0x1a   : > { %p154_p4 = scmp.lt.s32.totalorder %s2384_s17, 3  ;;  %s171_s27 = sshll.u32 %s2871_s0, 4  ;;  %s172_s27 = int_to_ptr.hbm [resolvable:$true] %s171_s27 }
  0x1b   : > { %s2389_s29 = smov [#allocation3]   ;;  %s1473_s4 = sshll.u32 %s186_s23, 2 }
  0x1c   : > { %p2512_p5 = pnand %p1467_p13, %p154_p4  ;;  %s173_s30 = sshll.u32 %s2389_s29, 4  ;;  %s174_s30 = int_to_ptr.vmem [resolvable:$true] %s173_s30 }
  0x1d   : > { %s1474_s5 = sshll.u32 %s2380_s16, 2  ;;  %s213_s24 = scalar_lea.vmem [#allocation8], %s1473_s4 }
  0x1e   : > { %p2137_p1 = pneg %p2512_p5  ;;  %s217_s10 = scalar_lea.hbm %s2873_s2, %s1474_s5 }
  0x1f   : > { %s219_s19 = sshll.u32 %s217_s10, 4  ;;  %s221_s26 = sshll.u32 %s213_s24, 4  ;;  %s220_s19 = int_to_ptr.hbm [resolvable:$true] %s219_s19  ;;  %s222_s26 = int_to_ptr.vmem [resolvable:$true] %s221_s26 }
  0x20   : > { %p2138_p6 = pnand %p2137_p1, %p90_p9  ;;  %230 = sbr.rel (%p2512_p5) target bundleno = 317 (0x13d), region = 32 }
  0x21   : > { %2147 = dma.hbm_to_vmem [thread:$0]  (!%p2473_p7), %s220_s19, 64, %s222_s26, %s2477_s7  }
  0x22   : > { %2140 = dma.hbm_to_vmem [thread:$0]  (!%p2138_p6), %s172_s27, 256, %s174_s30, [#allocation4]  }
  0x25   : > { %2351 = dma.done.wait (%p90_p9), [#allocation4], 256  }
  0x26   : > { %2353 = vsyncadd (%p90_p9), [#allocation4], 4294967040  ;;  %s237_s23 = sand.u32 1, %s2483_s11   ;;  %s2537_s29 = sand.u32 1, %s2368_s13  }
  0x27   : > { %s1477_s27 = sshll.u32 %s2537_s29, 10  ;;  %s238_s30 = scalar_lea.sflag [#allocation7], %s237_s23 }
  0x28   : > { %s2540_s6 = scalar_lea.vmem [#allocation6], %s1477_s27 }
  0x29   : > { %2355 = dma.done.wait (%p2492_p12), %s238_s30, 16448  }
  0x2a   : > { %2357 = vsyncadd (%p2492_p12), %s238_s30, 4294950848  ;;  %v1594_v0 = vld [vmem:[%s2540_s6 + $0xe0] sm:$0xf]  ;;  %v2028_v1 = vld [vmem:[%s2540_s6 + $0xec] sm:$0xf0]  ;;  %s1478_s7 = sshll.u32 %s2537_s29, 2 }
  0x2b   : > { %v1722_v2 = vld [vmem:[%s2540_s6 + $0x1e0] sm:$0xf]  ;;  %v1595_v3 = vor.u32 %v2028_v1, %v1594_v0  ;;  %v2060_v4 = vld [vmem:[%s2540_s6 + $0x1ec] sm:$0xf0]  ;;  %s251_s11 = scalar_lea.vmem [#allocation8], %s1478_s7  ;;  %s1479_s20 = sshll.u32 %s2537_s29, 4 }
  0x2c   : > { %v1850_v5 = vld [vmem:[%s2540_s6 + $0x2e0] sm:$0xf]  ;;  %v2092_v6 = vld [vmem:[%s2540_s6 + $0x2ec] sm:$0xf0]  ;;  %v1723_v7 = vor.u32 %v2060_v4, %v1722_v2  ;;  %s2828_s28 = scalar_lea.vmem [#allocation9], %s1479_s20  ;;  %s2126_s4 = sshll.u32 %s2376_s15, 4 }
  0x2d   : > { %v1851_v8 = vor.u32 %v2092_v6, %v1850_v5  ;;  %v1978_v9 = vld [vmem:[%s2540_s6 + $0x3e0] sm:$0xf]  ;;  %v2124_v10 = vld [vmem:[%s2540_s6 + $0x3ec] sm:$0xf0]  ;;  %1081 = vmatpush.bf16.msra.mxu0 %v1595_v3  ;;  %s1336_s9 = scalar_lea.hbm %s2874_s3, %s2126_s4  ;;  %s1338_s10 = sshll.u32 %s2828_s28, 4  ;;  %s1339_s10 = int_to_ptr.vmem [resolvable:$true] %s1338_s10 }
  0x2e   : > { %v1578_v11 = vld [vmem:[%s2540_s6 + $0xc0] sm:$0xf]  ;;  %v1979_v12 = vor.u32 %v2124_v10, %v1978_v9  ;;  %v2024_v13 = vld [vmem:[%s2540_s6 + $0xcc] sm:$0xf0]  ;;  %1094 = vmatpush.bf16.msra.mxu1 %v1723_v7  ;;  %s1340_s19 = sshll.u32 %s1336_s9, 4  ;;  %s1323_s15 = scalar_lea.sflag [#allocation5], %s2537_s29  ;;  %s1341_s19 = int_to_ptr.hbm [resolvable:$true] %s1340_s19 }
  0x2f   : > { %v1706_v14 = vld [vmem:[%s2540_s6 + $0x1c0] sm:$0xf]  ;;  %v2056_v15 = vld [vmem:[%s2540_s6 + $0x1cc] sm:$0xf0]  ;;  %1107 = vmatpush.bf16.msra.mxu2 %v1851_v8  ;;  %v1579_v16 = vor.u32 %v2024_v13, %v1578_v11  ;;  %s2312_s24 = sshra.s32 %s1341_s19, 4  ;;  %s2318_s30 = scalar_lea.hbm %s2874_s3, 32  ;;  %s2313_s24 = int_to_ptr.hbm [resolvable:$true] %s2312_s24 }
  0x30   : > { %v1707_v17 = vor.u32 %v2056_v15, %v1706_v14  ;;  %v1834_v18 = vld [vmem:[%s2540_s6 + $0x2c0] sm:$0xf]  ;;  %v2088_v19 = vld [vmem:[%s2540_s6 + $0x2cc] sm:$0xf0]  ;;  %1120 = vmatpush.bf16.msra.mxu3 %v1979_v12  ;;  %s2314_s26 = scalar_lea.hbm %s2313_s24, 16  ;;  %p2319_p10 = scmp.lt.s32.totalorder %s2313_s24, %s2874_s3 }
  0x31   : > { %v1962_v20 = vld [vmem:[%s2540_s6 + $0x3c0] sm:$0xf]  ;;  %v1835_v21 = vor.u32 %v2088_v19, %v1834_v18  ;;  %v2120_v22 = vld [vmem:[%s2540_s6 + $0x3cc] sm:$0xf0]  ;;  %1082 = vmatpush.bf16.msra.mxu0 %v1579_v16  ;;  %p2315_p7 = scmp.ne.s32.totalorder %s2313_s24, %s2314_s26  ;;  %p2320_p11 = scmp.lt.s32.totalorder %s2318_s30, %s2314_s26 }
  0x32   : > { %v1562_v23 = vld [vmem:[%s2540_s6 + $0xa0] sm:$0xf]  ;;  %v2020_v24 = vld [vmem:[%s2540_s6 + $0xac] sm:$0xf0]  ;;  %v1963_v25 = vor.u32 %v2120_v22, %v1962_v20  ;;  %1095 = vmatpush.bf16.msra.mxu1 %v1707_v17 }
  0x33   : > { %v1690_v26 = vld [vmem:[%s2540_s6 + $0x1a0] sm:$0xf]  ;;  %v2052_v27 = vld [vmem:[%s2540_s6 + $0x1ac] sm:$0xf0]  ;;  %v1563_v29 = vor.u32 %v2020_v24, %v1562_v23  ;;  %1108 = vmatpush.bf16.msra.mxu2 %v1835_v21  ;;  %p2316_p8 = pnand %p2315_p7, %p2500_p0  ;;  %p2321_p12 = por %p2320_p11, %p2319_p10 }
  0x34   : > { %v1818_v28 = vld [vmem:[%s2540_s6 + $0x2a0] sm:$0xf]  ;;  %v2084_v30 = vld [vmem:[%s2540_s6 + $0x2ac] sm:$0xf0]  ;;  %v1691_v33 = vor.u32 %v2052_v27, %v1690_v26  ;;  %1121 = vmatpush.bf16.msra.mxu3 %v1963_v25 }
  0x35   : > { %v1946_v31 = vld [vmem:[%s2540_s6 + $0x3a0] sm:$0xf]  ;;  %v2116_v32 = vld [vmem:[%s2540_s6 + $0x3ac] sm:$0xf0]  ;;  %v1819_v34 = vor.u32 %v2084_v30, %v1818_v28  ;;  %1083 = vmatpush.bf16.msra.mxu0 %v1563_v29  ;;  %v2026_v28 = vld [vmem:[%s2540_s6 + $0xe4] sm:$0xf]  ;;  %p2317_p9 = pneg %p2316_p8 }
  0x36   : > { %v1546_v35 = vld [vmem:[%s2540_s6 + $0x80] sm:$0xf]  ;;  %v2016_v36 = vld [vmem:[%s2540_s6 + $0x8c] sm:$0xf0]  ;;  %v1947_v38 = vor.u32 %v2116_v32, %v1946_v31  ;;  %1096 = vmatpush.bf16.msra.mxu1 %v1691_v33  ;;  %v1596_v29 = vld [vmem:[%s2540_s6 + $0xf0] sm:$0xf0] }
  0x37   : > { %v1674_v37 = vld [vmem:[%s2540_s6 + $0x180] sm:$0xf]  ;;  %v2048_v39 = vld [vmem:[%s2540_s6 + $0x18c] sm:$0xf0]  ;;  %v1547_v44 = vor.u32 %v2016_v36, %v1546_v35  ;;  %1109 = vmatpush.bf16.msra.mxu2 %v1819_v34  ;;  %v2058_v30 = vld [vmem:[%s2540_s6 + $0x1e4] sm:$0xf]  ;;  %p2322_p13 = pnand %p2321_p12, %p2317_p9 }
  0x38   : > { %v1802_v40 = vld [vmem:[%s2540_s6 + $0x280] sm:$0xf]  ;;  %v2080_v41 = vld [vmem:[%s2540_s6 + $0x28c] sm:$0xf0]  ;;  %v1675_v45 = vor.u32 %v2048_v39, %v1674_v37  ;;  %1122 = vmatpush.bf16.msra.mxu3 %v1947_v38  ;;  %v1724_v32 = vld [vmem:[%s2540_s6 + $0x1f0] sm:$0xf0] }
  0x39   : > { %v1930_v42 = vld [vmem:[%s2540_s6 + $0x380] sm:$0xf]  ;;  %v2112_v43 = vld [vmem:[%s2540_s6 + $0x38c] sm:$0xf0]  ;;  %v1803_v46 = vor.u32 %v2080_v41, %v1802_v40  ;;  %1084 = vmatpush.bf16.msra.mxu0 %v1547_v44  ;;  %v2090_v33 = vld [vmem:[%s2540_s6 + $0x2e4] sm:$0xf]  ;;  %v1599_v40 = vor.u32 %v2026_v28, %v1596_v29  ;;  %v1727_v41 = vor.u32 %v2058_v30, %v1724_v32 }
  0x3a   : > { %v1530_v47 = vld [vmem:[%s2540_s6 + $0x60] sm:$0xf]  ;;  %v2012_v48 = vld [vmem:[%s2540_s6 + $0x6c] sm:$0xf0]  ;;  %v1931_v50 = vor.u32 %v2112_v43, %v1930_v42  ;;  %1097 = vmatpush.bf16.msra.mxu1 %v1675_v45  ;;  %v1852_v34 = vld [vmem:[%s2540_s6 + $0x2f0] sm:$0xf0] }
  0x3b   : > { %v1658_v49 = vld [vmem:[%s2540_s6 + $0x160] sm:$0xf]  ;;  %v2044_v51 = vld [vmem:[%s2540_s6 + $0x16c] sm:$0xf0]  ;;  %v1531_v56 = vor.u32 %v2012_v48, %v1530_v47  ;;  %1110 = vmatpush.bf16.msra.mxu2 %v1803_v46  ;;  %v2122_v37 = vld [vmem:[%s2540_s6 + $0x3e4] sm:$0xf]  ;;  %v1855_v42 = vor.u32 %v2090_v33, %v1852_v34 }
  0x3c   : > { %v1786_v52 = vld [vmem:[%s2540_s6 + $0x260] sm:$0xf]  ;;  %v2076_v53 = vld [vmem:[%s2540_s6 + $0x26c] sm:$0xf0]  ;;  %v1659_v57 = vor.u32 %v2044_v51, %v1658_v49  ;;  %1123 = vmatpush.bf16.msra.mxu3 %v1931_v50  ;;  %v1980_v38 = vld [vmem:[%s2540_s6 + $0x3f0] sm:$0xf0] }
  0x3d   : > { %v1914_v54 = vld [vmem:[%s2540_s6 + $0x360] sm:$0xf]  ;;  %v2108_v55 = vld [vmem:[%s2540_s6 + $0x36c] sm:$0xf0]  ;;  %v1787_v58 = vor.u32 %v2076_v53, %v1786_v52  ;;  %1085 = vmatpush.bf16.msra.mxu0 %v1531_v56  ;;  %v2022_v43 = vld [vmem:[%s2540_s6 + $0xc4] sm:$0xf]  ;;  %v1983_v46 = vor.u32 %v2122_v37, %v1980_v38 }
  0x3e   : > { %v1514_v59 = vld [vmem:[%s2540_s6 + $0x40] sm:$0xf]  ;;  %v2008_v60 = vld [vmem:[%s2540_s6 + $0x4c] sm:$0xf0]  ;;  %v1915_v62 = vor.u32 %v2108_v55, %v1914_v54  ;;  %1098 = vmatpush.bf16.msra.mxu1 %v1659_v57  ;;  %v1580_v44 = vld [vmem:[%s2540_s6 + $0xd0] sm:$0xf0] }
  0x3f   : > { %v1642_v61 = vld [vmem:[%s2540_s6 + $0x140] sm:$0xf]  ;;  %v2040_v63 = vld [vmem:[%s2540_s6 + $0x14c] sm:$0xf0]  ;;  %v1515_v4 = vor.u32 %v2008_v60, %v1514_v59  ;;  %1111 = vmatpush.bf16.msra.mxu2 %v1787_v58  ;;  %v2054_v45 = vld [vmem:[%s2540_s6 + $0x1c4] sm:$0xf]  ;;  %v1583_v53 = vor.u32 %v2022_v43, %v1580_v44 }
  0x40   : > { %v1770_v0 = vld [vmem:[%s2540_s6 + $0x240] sm:$0xf]  ;;  %v2072_v1 = vld [vmem:[%s2540_s6 + $0x24c] sm:$0xf0]  ;;  %v1643_v5 = vor.u32 %v2040_v63, %v1642_v61  ;;  %1124 = vmatpush.bf16.msra.mxu3 %v1915_v62  ;;  %v1708_v47 = vld [vmem:[%s2540_s6 + $0x1d0] sm:$0xf0] }
  0x41   : > { %v1898_v2 = vld [vmem:[%s2540_s6 + $0x340] sm:$0xf]  ;;  %v2104_v3 = vld [vmem:[%s2540_s6 + $0x34c] sm:$0xf0]  ;;  %v1771_v6 = vor.u32 %v2072_v1, %v1770_v0  ;;  %1086 = vmatpush.bf16.msra.mxu0 %v1515_v4  ;;  %v2086_v48 = vld [vmem:[%s2540_s6 + $0x2c4] sm:$0xf]  ;;  %v1711_v57 = vor.u32 %v2054_v45, %v1708_v47 }
  0x42   : > { %v1498_v7 = vld [vmem:[%s2540_s6 + $0x20] sm:$0xf]  ;;  %v2004_v8 = vld [vmem:[%s2540_s6 + $0x2c] sm:$0xf0]  ;;  %v1899_v10 = vor.u32 %v2104_v3, %v1898_v2  ;;  %1099 = vmatpush.bf16.msra.mxu1 %v1643_v5  ;;  %v1836_v49 = vld [vmem:[%s2540_s6 + $0x2d0] sm:$0xf0] }
  0x43   : > { %v1626_v9 = vld [vmem:[%s2540_s6 + $0x120] sm:$0xf]  ;;  %v2036_v11 = vld [vmem:[%s2540_s6 + $0x12c] sm:$0xf0]  ;;  %v1499_v16 = vor.u32 %v2004_v8, %v1498_v7  ;;  %1112 = vmatpush.bf16.msra.mxu2 %v1771_v6  ;;  %v2118_v50 = vld [vmem:[%s2540_s6 + $0x3c4] sm:$0xf]  ;;  %v1839_v58 = vor.u32 %v2086_v48, %v1836_v49 }
  0x44   : > { %v1754_v12 = vld [vmem:[%s2540_s6 + $0x220] sm:$0xf]  ;;  %v2068_v13 = vld [vmem:[%s2540_s6 + $0x22c] sm:$0xf0]  ;;  %v1627_v19 = vor.u32 %v2036_v11, %v1626_v9  ;;  %1125 = vmatpush.bf16.msra.mxu3 %v1899_v10  ;;  %v1964_v51 = vld [vmem:[%s2540_s6 + $0x3d0] sm:$0xf0] }
  0x45   : > { %v1882_v14 = vld [vmem:[%s2540_s6 + $0x320] sm:$0xf]  ;;  %v2100_v15 = vld [vmem:[%s2540_s6 + $0x32c] sm:$0xf0]  ;;  %v1755_v20 = vor.u32 %v2068_v13, %v1754_v12  ;;  %1087 = vmatpush.bf16.msra.mxu0 %v1499_v16  ;;  %v298_v52 = vld [vmem:[#allocation3 + $0x8] sm:$0xff]  ;;  %v1967_v62 = vor.u32 %v2118_v50, %v1964_v51 }
  0x46   : > { %v1482_v17 = vld [vmem:[%s2540_s6] sm:$0xf]  ;;  %v2000_v18 = vld [vmem:[%s2540_s6 + $0xc] sm:$0xf0]  ;;  %v1883_v24 = vor.u32 %v2100_v15, %v1882_v14  ;;  %1100 = vmatpush.bf16.msra.mxu1 %v1627_v19  ;;  %v2018_v54 = vld [vmem:[%s2540_s6 + $0xa4] sm:$0xf]  ;;  %v431_v55 = vunpack.c.l.b16 %v298_v52  ;;  %v432_v56 = vunpack.c.h.b16 %v298_v52 }
  0x47   : > { %v1610_v21 = vld [vmem:[%s2540_s6 + $0x100] sm:$0xf]  ;;  %v2032_v22 = vld [vmem:[%s2540_s6 + $0x10c] sm:$0xf0]  ;;  %v1483_v31 = vor.u32 %v2000_v18, %v1482_v17  ;;  %1113 = vmatpush.bf16.msra.mxu2 %v1755_v20  ;;  %v1564_v59 = vld [vmem:[%s2540_s6 + $0xb0] sm:$0xf0] }
  0x48   : > { %v1738_v23 = vld [vmem:[%s2540_s6 + $0x200] sm:$0xf]  ;;  %v2064_v25 = vld [vmem:[%s2540_s6 + $0x20c] sm:$0xf0]  ;;  %v1611_v35 = vor.u32 %v2032_v22, %v1610_v21  ;;  %1126 = vmatpush.bf16.msra.mxu3 %v1883_v24  ;;  %v2050_v60 = vld [vmem:[%s2540_s6 + $0x1a4] sm:$0xf]  ;;  %v2632_v1 = vpack.c.b16 %v431_v55, %v431_v55  ;;  %v2636_v5 = vpack.c.b16 %v432_v56, %v432_v56  ;;  %v1567_v8 = vor.u32 %v2018_v54, %v1564_v59 }
  0x49   : > { %v1866_v26 = vld [vmem:[%s2540_s6 + $0x300] sm:$0xf]  ;;  %v2096_v27 = vld [vmem:[%s2540_s6 + $0x30c] sm:$0xf0]  ;;  %v1739_v36 = vor.u32 %v2064_v25, %v1738_v23  ;;  %1088 = vmatpush.bf16.msra.mxu0 %v1483_v31  ;;  %v1692_v61 = vld [vmem:[%s2540_s6 + $0x1b0] sm:$0xf0] }
  0x4a   : > { %v1867_v39 = vor.u32 %v2096_v27, %v1866_v26  ;;  %1101 = vmatpush.bf16.msra.mxu1 %v1611_v35  ;;  %v2082_v63 = vld [vmem:[%s2540_s6 + $0x2a4] sm:$0xf]  ;;  %v1820_v0 = vld [vmem:[%s2540_s6 + $0x2b0] sm:$0xf0]  ;;  %v1695_v9 = vor.u32 %v2050_v60, %v1692_v61 }
  0x4b   : > { %1114 = vmatpush.bf16.msra.mxu2 %v1739_v36  ;;  %v297_v2 = vld [vmem:[#allocation3] sm:$0xff]  ;;  %v2114_v3 = vld [vmem:[%s2540_s6 + $0x3a4] sm:$0xf]  ;;  %v1823_v10 = vor.u32 %v2082_v63, %v1820_v0 }
  0x4c   : > { %1127 = vmatpush.bf16.msra.mxu3 %v1867_v39  ;;  %v1948_v4 = vld [vmem:[%s2540_s6 + $0x3b0] sm:$0xf0]  ;;  %v429_v6 = vunpack.c.l.b16 %v297_v2  ;;  %v430_v7 = vunpack.c.h.b16 %v297_v2  ;;  %v2014_v11 = vld [vmem:[%s2540_s6 + $0x84] sm:$0xf] }
  0x4d   : > { %1133 = vmatpush.bf16.msrb.mxu0 %v1599_v40  ;;  %v1548_v12 = vld [vmem:[%s2540_s6 + $0x90] sm:$0xf0]  ;;  %v2046_v13 = vld [vmem:[%s2540_s6 + $0x184] sm:$0xf]  ;;  %v1951_v16 = vor.u32 %v2114_v3, %v1948_v4 }
  0x4e   : > { %1146 = vmatpush.bf16.msrb.mxu1 %v1727_v41  ;;  %1115 = vmatmul.bf16.vlgmr.msra.gmra.mxu2 %v2632_v1  ;;  %v2642_v14 = vpack.c.b16 %v429_v6, %v429_v6  ;;  %v2644_v15 = vpack.c.b16 %v430_v7, %v430_v7  ;;  %v1676_v17 = vld [vmem:[%s2540_s6 + $0x190] sm:$0xf0]  ;;  %v2078_v18 = vld [vmem:[%s2540_s6 + $0x284] sm:$0xf]  ;;  %v1551_v22 = vor.u32 %v2014_v11, %v1548_v12  ;;  %v2061_v12 = vld [vmem:[%s2540_s6 + $0x1f4] sm:$0xf0] }
  0x4f   : > { %1159 = vmatpush.bf16.msrb.mxu2 %v1855_v42  ;;  %v1804_v19 = vld [vmem:[%s2540_s6 + $0x290] sm:$0xf0]  ;;  %v2110_v20 = vld [vmem:[%s2540_s6 + $0x384] sm:$0xf]  ;;  %1128 = vmatmul.bf16.vlgmr.msra.gmra.mxu3 %v2636_v5  ;;  %v1679_v23 = vor.u32 %v2046_v13, %v1676_v17  ;;  %v1858_v13 = vld [vmem:[%s2540_s6 + $0x2e8] sm:$0xf] }
  0x50   : > { %1172 = vmatpush.bf16.msrb.mxu3 %v1983_v46  ;;  %v1932_v21 = vld [vmem:[%s2540_s6 + $0x390] sm:$0xf0]  ;;  %1089 = vmatmul.bf16.vlgmr.msra.gmra.mxu0 %v2642_v14  ;;  %v1807_v24 = vor.u32 %v2078_v18, %v1804_v19  ;;  %v2010_v25 = vld [vmem:[%s2540_s6 + $0x64] sm:$0xf]  ;;  %v1986_v19 = vld [vmem:[%s2540_s6 + $0x3e8] sm:$0xf] }
  0x51   : > { %1134 = vmatpush.bf16.msrb.mxu0 %v1583_v53  ;;  %1102 = vmatmul.bf16.vlgmr.msra.gmra.mxu1 %v2644_v15  ;;  %v1532_v26 = vld [vmem:[%s2540_s6 + $0x70] sm:$0xf0]  ;;  %v2042_v27 = vld [vmem:[%s2540_s6 + $0x164] sm:$0xf]  ;;  %v1935_v28 = vor.u32 %v2110_v20, %v1932_v21  ;;  %v2125_v20 = vld [vmem:[%s2540_s6 + $0x3f4] sm:$0xf0] }
  0x52   : > { %1147 = vmatpush.bf16.msrb.mxu1 %v1711_v57  ;;  %v1660_v29 = vld [vmem:[%s2540_s6 + $0x170] sm:$0xf0]  ;;  %v2074_v30 = vld [vmem:[%s2540_s6 + $0x264] sm:$0xf]  ;;  %v1535_v34 = vor.u32 %v2010_v25, %v1532_v26  ;;  %v1586_v25 = vld [vmem:[%s2540_s6 + $0xc8] sm:$0xf] }
  0x53   : > { %1160 = vmatpush.bf16.msrb.mxu2 %v1839_v58  ;;  %v1788_v31 = vld [vmem:[%s2540_s6 + $0x270] sm:$0xf0]  ;;  %v2106_v32 = vld [vmem:[%s2540_s6 + $0x364] sm:$0xf]  ;;  %v1663_v35 = vor.u32 %v2042_v27, %v1660_v29  ;;  %v2025_v26 = vld [vmem:[%s2540_s6 + $0xd4] sm:$0xf0] }
  0x54   : > { %1173 = vmatpush.bf16.msrb.mxu3 %v1967_v62  ;;  %v1916_v33 = vld [vmem:[%s2540_s6 + $0x370] sm:$0xf0]  ;;  %v1791_v36 = vor.u32 %v2074_v30, %v1788_v31  ;;  %v2006_v37 = vld [vmem:[%s2540_s6 + $0x44] sm:$0xf]  ;;  %v1714_v27 = vld [vmem:[%s2540_s6 + $0x1c8] sm:$0xf] }
  0x55   : > { %1135 = vmatpush.bf16.msrb.mxu0 %v1567_v8  ;;  %v1516_v38 = vld [vmem:[%s2540_s6 + $0x50] sm:$0xf0]  ;;  %v2038_v39 = vld [vmem:[%s2540_s6 + $0x144] sm:$0xf]  ;;  %v1919_v40 = vor.u32 %v2106_v32, %v1916_v33  ;;  %v1602_v8 = vld [vmem:[%s2540_s6 + $0xe8] sm:$0xf] }
  0x56   : > { %1148 = vmatpush.bf16.msrb.mxu1 %v1695_v9  ;;  %v1644_v41 = vld [vmem:[%s2540_s6 + $0x150] sm:$0xf0]  ;;  %v2070_v42 = vld [vmem:[%s2540_s6 + $0x244] sm:$0xf]  ;;  %v1519_v46 = vor.u32 %v2006_v37, %v1516_v38  ;;  %v2029_v9 = vld [vmem:[%s2540_s6 + $0xf4] sm:$0xf0] }
  0x57   : > { %1161 = vmatpush.bf16.msrb.mxu2 %v1823_v10  ;;  %v1772_v43 = vld [vmem:[%s2540_s6 + $0x250] sm:$0xf0]  ;;  %v2102_v44 = vld [vmem:[%s2540_s6 + $0x344] sm:$0xf]  ;;  %v1647_v47 = vor.u32 %v2038_v39, %v1644_v41  ;;  %v1730_v10 = vld [vmem:[%s2540_s6 + $0x1e8] sm:$0xf] }
  0x58   : > { %1174 = vmatpush.bf16.msrb.mxu3 %v1951_v16  ;;  %v1900_v45 = vld [vmem:[%s2540_s6 + $0x350] sm:$0xf0]  ;;  %v1775_v48 = vor.u32 %v2070_v42, %v1772_v43  ;;  %v2002_v49 = vld [vmem:[%s2540_s6 + $0x24] sm:$0xf]  ;;  %v2093_v16 = vld [vmem:[%s2540_s6 + $0x2f4] sm:$0xf0] }
  0x59   : > { %1136 = vmatpush.bf16.msrb.mxu0 %v1551_v22  ;;  %v1500_v50 = vld [vmem:[%s2540_s6 + $0x30] sm:$0xf0]  ;;  %v2034_v51 = vld [vmem:[%s2540_s6 + $0x124] sm:$0xf]  ;;  %v1903_v52 = vor.u32 %v2102_v44, %v1900_v45  ;;  %v1603_v22 = vor.u32 %v2029_v9, %v1602_v8  ;;  %v2057_v29 = vld [vmem:[%s2540_s6 + $0x1d4] sm:$0xf0] }
  0x5a   : > { %1149 = vmatpush.bf16.msrb.mxu1 %v1679_v23  ;;  %v1628_v53 = vld [vmem:[%s2540_s6 + $0x130] sm:$0xf0]  ;;  %v2066_v54 = vld [vmem:[%s2540_s6 + $0x224] sm:$0xf]  ;;  %v1503_v58 = vor.u32 %v2002_v49, %v1500_v50  ;;  %v1731_v23 = vor.u32 %v2061_v12, %v1730_v10  ;;  %v1842_v30 = vld [vmem:[%s2540_s6 + $0x2c8] sm:$0xf] }
  0x5b   : > { %1162 = vmatpush.bf16.msrb.mxu2 %v1807_v24  ;;  %v1756_v55 = vld [vmem:[%s2540_s6 + $0x230] sm:$0xf0]  ;;  %v2098_v56 = vld [vmem:[%s2540_s6 + $0x324] sm:$0xf]  ;;  %v1631_v61 = vor.u32 %v2034_v51, %v1628_v53  ;;  %v1859_v24 = vor.u32 %v2093_v16, %v1858_v13  ;;  %v2089_v31 = vld [vmem:[%s2540_s6 + $0x2d4] sm:$0xf0] }
  0x5c   : > { %1175 = vmatpush.bf16.msrb.mxu3 %v1935_v28  ;;  %v1884_v57 = vld [vmem:[%s2540_s6 + $0x330] sm:$0xf0]  ;;  %v1998_v59 = vld [vmem:[%s2540_s6 + $0x4] sm:$0xf]  ;;  %v1759_v62 = vor.u32 %v2066_v54, %v1756_v55  ;;  %v1987_v28 = vor.u32 %v2125_v20, %v1986_v19  ;;  %v1970_v32 = vld [vmem:[%s2540_s6 + $0x3c8] sm:$0xf] }
  0x5d   : > { %1137 = vmatpush.bf16.msrb.mxu0 %v1535_v34  ;;  %v1484_v60 = vld [vmem:[%s2540_s6 + $0x10] sm:$0xf0]  ;;  %v2030_v63 = vld [vmem:[%s2540_s6 + $0x104] sm:$0xf]  ;;  %v1887_v3 = vor.u32 %v2098_v56, %v1884_v57  ;;  %v2121_v33 = vld [vmem:[%s2540_s6 + $0x3d4] sm:$0xf0]  ;;  %v1587_v34 = vor.u32 %v2025_v26, %v1586_v25 }
  0x5e   : > { %1150 = vmatpush.bf16.msrb.mxu1 %v1663_v35  ;;  %v1612_v0 = vld [vmem:[%s2540_s6 + $0x110] sm:$0xf0]  ;;  %v2062_v2 = vld [vmem:[%s2540_s6 + $0x204] sm:$0xf]  ;;  %v1487_v11 = vor.u32 %v1998_v59, %v1484_v60  ;;  %v1715_v35 = vor.u32 %v2057_v29, %v1714_v27  ;;  %v1570_v37 = vld [vmem:[%s2540_s6 + $0xa8] sm:$0xf] }
  0x5f   : > { %1163 = vmatpush.bf16.msrb.mxu2 %v1791_v36  ;;  %v1740_v4 = vld [vmem:[%s2540_s6 + $0x210] sm:$0xf0]  ;;  %v2094_v6 = vld [vmem:[%s2540_s6 + $0x304] sm:$0xf]  ;;  %v1615_v17 = vor.u32 %v2030_v63, %v1612_v0  ;;  %v1843_v36 = vor.u32 %v2089_v31, %v1842_v30  ;;  %v2021_v38 = vld [vmem:[%s2540_s6 + $0xb4] sm:$0xf0] }
  0x60   : > { %1176 = vmatpush.bf16.msrb.mxu3 %v1919_v40  ;;  %v1868_v7 = vld [vmem:[%s2540_s6 + $0x310] sm:$0xf0]  ;;  %v1743_v18 = vor.u32 %v2062_v2, %v1740_v4  ;;  %v1698_v39 = vld [vmem:[%s2540_s6 + $0x1a8] sm:$0xf]  ;;  %v1971_v40 = vor.u32 %v2121_v33, %v1970_v32  ;;  %v2053_v41 = vld [vmem:[%s2540_s6 + $0x1b4] sm:$0xf0] }
  0x61   : > { %1138 = vmatpush.bf16.msrb.mxu0 %v1519_v46  ;;  %v1871_v21 = vor.u32 %v2094_v6, %v1868_v7  ;;  %v1826_v42 = vld [vmem:[%s2540_s6 + $0x2a8] sm:$0xf]  ;;  %v2085_v43 = vld [vmem:[%s2540_s6 + $0x2b4] sm:$0xf0]  ;;  %v1571_v46 = vor.u32 %v2021_v38, %v1570_v37 }
  0x62   : > { %1151 = vmatpush.bf16.msrb.mxu1 %v1647_v47  ;;  %v1954_v44 = vld [vmem:[%s2540_s6 + $0x3a8] sm:$0xf]  ;;  %v2117_v45 = vld [vmem:[%s2540_s6 + $0x3b4] sm:$0xf0]  ;;  %v1699_v47 = vor.u32 %v2053_v41, %v1698_v39 }
  0x63   : > { %1164 = vmatpush.bf16.msrb.mxu2 %v1775_v48  ;;  %v1827_v48 = vor.u32 %v2085_v43, %v1826_v42  ;;  %v1554_v49 = vld [vmem:[%s2540_s6 + $0x88] sm:$0xf]  ;;  %v2017_v50 = vld [vmem:[%s2540_s6 + $0x94] sm:$0xf0] }
  0x64   : > { %1177 = vmatpush.bf16.msrb.mxu3 %v1903_v52  ;;  %v1682_v51 = vld [vmem:[%s2540_s6 + $0x188] sm:$0xf]  ;;  %v1955_v52 = vor.u32 %v2117_v45, %v1954_v44  ;;  %v2049_v53 = vld [vmem:[%s2540_s6 + $0x194] sm:$0xf0] }
  0x65   : > { %1139 = vmatpush.bf16.msrb.mxu0 %v1503_v58  ;;  %v1810_v54 = vld [vmem:[%s2540_s6 + $0x288] sm:$0xf]  ;;  %v2081_v55 = vld [vmem:[%s2540_s6 + $0x294] sm:$0xf0]  ;;  %v1555_v58 = vor.u32 %v2017_v50, %v1554_v49  ;;  %v1683_v59 = vor.u32 %v2049_v53, %v1682_v51  ;;  %v1732_v50 = vld [vmem:[%s2540_s6 + $0x1f8] sm:$0xf0] }
  0x66   : > { %1152 = vmatpush.bf16.msrb.mxu1 %v1631_v61  ;;  %v1938_v56 = vld [vmem:[%s2540_s6 + $0x388] sm:$0xf]  ;;  %v2113_v57 = vld [vmem:[%s2540_s6 + $0x394] sm:$0xf0]  ;;  %v1811_v60 = vor.u32 %v2081_v55, %v1810_v54  ;;  %v2091_v51 = vld [vmem:[%s2540_s6 + $0x2ec] sm:$0xf] }
  0x67   : > { %1165 = vmatpush.bf16.msrb.mxu2 %v1759_v62  ;;  %v1538_v61 = vld [vmem:[%s2540_s6 + $0x68] sm:$0xf]  ;;  %v2013_v62 = vld [vmem:[%s2540_s6 + $0x74] sm:$0xf0]  ;;  %v1939_v0 = vor.u32 %v2113_v57, %v1938_v56  ;;  %v2123_v55 = vld [vmem:[%s2540_s6 + $0x3ec] sm:$0xf] }
  0x68   : > { %1178 = vmatpush.bf16.msrb.mxu3 %v1887_v3  ;;  %v1666_v63 = vld [vmem:[%s2540_s6 + $0x168] sm:$0xf]  ;;  %v2045_v2 = vld [vmem:[%s2540_s6 + $0x174] sm:$0xf0]  ;;  %v1539_v8 = vor.u32 %v2013_v62, %v1538_v61  ;;  %v1988_v56 = vld [vmem:[%s2540_s6 + $0x3f8] sm:$0xf0] }
  0x69   : > { %1140 = vmatpush.bf16.msrb.mxu0 %v1487_v11  ;;  %v1794_v3 = vld [vmem:[%s2540_s6 + $0x268] sm:$0xf]  ;;  %v2077_v4 = vld [vmem:[%s2540_s6 + $0x274] sm:$0xf0]  ;;  %v1667_v9 = vor.u32 %v2045_v2, %v1666_v63  ;;  %v2023_v61 = vld [vmem:[%s2540_s6 + $0xcc] sm:$0xf] }
  0x6a   : > { %1153 = vmatpush.bf16.msrb.mxu1 %v1615_v17  ;;  %v1922_v6 = vld [vmem:[%s2540_s6 + $0x368] sm:$0xf]  ;;  %v2109_v7 = vld [vmem:[%s2540_s6 + $0x374] sm:$0xf0]  ;;  %v1795_v10 = vor.u32 %v2077_v4, %v1794_v3  ;;  %v1588_v62 = vld [vmem:[%s2540_s6 + $0xd8] sm:$0xf0] }
  0x6b   : > { %1166 = vmatpush.bf16.msrb.mxu2 %v1743_v18  ;;  %v1522_v11 = vld [vmem:[%s2540_s6 + $0x48] sm:$0xf]  ;;  %v2009_v12 = vld [vmem:[%s2540_s6 + $0x54] sm:$0xf0]  ;;  %v1923_v16 = vor.u32 %v2109_v7, %v1922_v6  ;;  %v2055_v63 = vld [vmem:[%s2540_s6 + $0x1cc] sm:$0xf] }
  0x6c   : > { %1179 = vmatpush.bf16.msrb.mxu3 %v1871_v21  ;;  %1141 = vmatmul.bf16.vlgmr.msrb.gmra.mxu0 %v2642_v14  ;;  %v1650_v13 = vld [vmem:[%s2540_s6 + $0x148] sm:$0xf]  ;;  %v2041_v17 = vld [vmem:[%s2540_s6 + $0x154] sm:$0xf0]  ;;  %v1716_v2 = vld [vmem:[%s2540_s6 + $0x1d8] sm:$0xf0] }
  0x6d   : > { %1185 = vmatpush.bf16.msra.mxu0 %v1603_v22  ;;  %1154 = vmatmul.bf16.vlgmr.msrb.gmra.mxu1 %v2644_v15  ;;  %v1778_v18 = vld [vmem:[%s2540_s6 + $0x248] sm:$0xf]  ;;  %v2073_v19 = vld [vmem:[%s2540_s6 + $0x254] sm:$0xf0]  ;;  %v1523_v22 = vor.u32 %v2009_v12, %v1522_v11  ;;  %v2087_v3 = vld [vmem:[%s2540_s6 + $0x2cc] sm:$0xf] }
  0x6e   : > { %1198 = vmatpush.bf16.msra.mxu1 %v1731_v23  ;;  %1167 = vmatmul.bf16.vlgmr.msrb.gmra.mxu2 %v2632_v1  ;;  %v1906_v20 = vld [vmem:[%s2540_s6 + $0x348] sm:$0xf]  ;;  %v2105_v21 = vld [vmem:[%s2540_s6 + $0x354] sm:$0xf0]  ;;  %v1651_v23 = vor.u32 %v2041_v17, %v1650_v13  ;;  %v1844_v4 = vld [vmem:[%s2540_s6 + $0x2d8] sm:$0xf0] }
  0x6f   : > { %1211 = vmatpush.bf16.msra.mxu2 %v1859_v24  ;;  %1180 = vmatmul.bf16.vlgmr.msrb.gmra.mxu3 %v2636_v5  ;;  %v1779_v24 = vor.u32 %v2073_v19, %v1778_v18  ;;  %v1506_v25 = vld [vmem:[%s2540_s6 + $0x28] sm:$0xf]  ;;  %v2005_v26 = vld [vmem:[%s2540_s6 + $0x34] sm:$0xf0]  ;;  %v2119_v6 = vld [vmem:[%s2540_s6 + $0x3cc] sm:$0xf] }
  0x70   : > { %1224 = vmatpush.bf16.msra.mxu3 %v1987_v28  ;;  %v1634_v27 = vld [vmem:[%s2540_s6 + $0x128] sm:$0xf]  ;;  %v1907_v28 = vor.u32 %v2105_v21, %v1906_v20  ;;  %v2037_v29 = vld [vmem:[%s2540_s6 + $0x134] sm:$0xf0]  ;;  %v1972_v7 = vld [vmem:[%s2540_s6 + $0x3d8] sm:$0xf0] }
  0x71   : > { %1186 = vmatpush.bf16.msra.mxu0 %v1587_v34  ;;  %v1762_v30 = vld [vmem:[%s2540_s6 + $0x228] sm:$0xf]  ;;  %v2069_v31 = vld [vmem:[%s2540_s6 + $0x234] sm:$0xf0]  ;;  %v1507_v34 = vor.u32 %v2005_v26, %v1506_v25  ;;  %v1635_v37 = vor.u32 %v2037_v29, %v1634_v27  ;;  %v2019_v11 = vld [vmem:[%s2540_s6 + $0xac] sm:$0xf] }
  0x72   : > { %1199 = vmatpush.bf16.msra.mxu1 %v1715_v35  ;;  %v1890_v32 = vld [vmem:[%s2540_s6 + $0x328] sm:$0xf]  ;;  %v2101_v33 = vld [vmem:[%s2540_s6 + $0x334] sm:$0xf0]  ;;  %v1763_v38 = vor.u32 %v2069_v31, %v1762_v30  ;;  %v1572_v12 = vld [vmem:[%s2540_s6 + $0xb8] sm:$0xf0] }
  0x73   : > { %1212 = vmatpush.bf16.msra.mxu2 %v1843_v36  ;;  %v1490_v35 = vld [vmem:[%s2540_s6 + $0x8] sm:$0xf]  ;;  %v2001_v36 = vld [vmem:[%s2540_s6 + $0x14] sm:$0xf0]  ;;  %v1891_v42 = vor.u32 %v2101_v33, %v1890_v32  ;;  %v2051_v13 = vld [vmem:[%s2540_s6 + $0x1ac] sm:$0xf] }
  0x74   : > { %1225 = vmatpush.bf16.msra.mxu3 %v1971_v40  ;;  %v1618_v39 = vld [vmem:[%s2540_s6 + $0x108] sm:$0xf]  ;;  %v2033_v40 = vld [vmem:[%s2540_s6 + $0x114] sm:$0xf0]  ;;  %v1491_v49 = vor.u32 %v2001_v36, %v1490_v35  ;;  %v1700_v17 = vld [vmem:[%s2540_s6 + $0x1b8] sm:$0xf0] }
  0x75   : > { %1187 = vmatpush.bf16.msra.mxu0 %v1571_v46  ;;  %v1746_v41 = vld [vmem:[%s2540_s6 + $0x208] sm:$0xf]  ;;  %v2065_v43 = vld [vmem:[%s2540_s6 + $0x214] sm:$0xf0]  ;;  %v2027_v46 = vld [vmem:[%s2540_s6 + $0xec] sm:$0xf]  ;;  %v1619_v53 = vor.u32 %v2033_v40, %v1618_v39 }
  0x76   : > { %1200 = vmatpush.bf16.msra.mxu1 %v1699_v47  ;;  %v1874_v44 = vld [vmem:[%s2540_s6 + $0x308] sm:$0xf]  ;;  %v2097_v45 = vld [vmem:[%s2540_s6 + $0x314] sm:$0xf0]  ;;  %v1604_v47 = vld [vmem:[%s2540_s6 + $0xf8] sm:$0xf0]  ;;  %v1747_v54 = vor.u32 %v2065_v43, %v1746_v41 }
  0x77   : > { %1213 = vmatpush.bf16.msra.mxu2 %v1827_v48  ;;  %v2059_v48 = vld [vmem:[%s2540_s6 + $0x1ec] sm:$0xf]  ;;  %v1875_v57 = vor.u32 %v2097_v45, %v1874_v44  ;;  %v1828_v19 = vld [vmem:[%s2540_s6 + $0x2b8] sm:$0xf0] }
  0x78   : > { %1226 = vmatpush.bf16.msra.mxu3 %v1955_v52  ;;  %v1860_v52 = vld [vmem:[%s2540_s6 + $0x2f8] sm:$0xf0]  ;;  %v2083_v18 = vld [vmem:[%s2540_s6 + $0x2ac] sm:$0xf] }
  0x79   : > { %1188 = vmatpush.bf16.msra.mxu0 %v1555_v58  ;;  %v1607_v58 = vor.u32 %v2027_v46, %v1604_v47  ;;  %v2115_v20 = vld [vmem:[%s2540_s6 + $0x3ac] sm:$0xf]  ;;  %v1956_v21 = vld [vmem:[%s2540_s6 + $0x3b8] sm:$0xf0] }
  0x7a   : > { %1201 = vmatpush.bf16.msra.mxu1 %v1683_v59  ;;  %v1735_v59 = vor.u32 %v2059_v48, %v1732_v50  ;;  %v2015_v25 = vld [vmem:[%s2540_s6 + $0x8c] sm:$0xf]  ;;  %v1556_v26 = vld [vmem:[%s2540_s6 + $0x98] sm:$0xf0] }
  0x7b   : > { %1214 = vmatpush.bf16.msra.mxu2 %v1811_v60  ;;  %v1863_v60 = vor.u32 %v2091_v51, %v1860_v52  ;;  %v2047_v27 = vld [vmem:[%s2540_s6 + $0x18c] sm:$0xf]  ;;  %v1684_v29 = vld [vmem:[%s2540_s6 + $0x198] sm:$0xf0] }
  0x7c   : > { %1227 = vmatpush.bf16.msra.mxu3 %v1939_v0  ;;  %v1991_v0 = vor.u32 %v2123_v55, %v1988_v56  ;;  %v2079_v30 = vld [vmem:[%s2540_s6 + $0x28c] sm:$0xf]  ;;  %v1812_v31 = vld [vmem:[%s2540_s6 + $0x298] sm:$0xf0]  ;;  %v1687_v35 = vor.u32 %v2047_v27, %v1684_v29 }
  0x7d   : > { %1189 = vmatpush.bf16.msra.mxu0 %v1539_v8  ;;  %v1591_v8 = vor.u32 %v2023_v61, %v1588_v62  ;;  %v2111_v32 = vld [vmem:[%s2540_s6 + $0x38c] sm:$0xf]  ;;  %v1940_v33 = vld [vmem:[%s2540_s6 + $0x398] sm:$0xf0]  ;;  %v1815_v36 = vor.u32 %v2079_v30, %v1812_v31 }
  0x7e   : > { %1202 = vmatpush.bf16.msra.mxu1 %v1667_v9  ;;  %v1719_v9 = vor.u32 %v2055_v63, %v1716_v2  ;;  %v2043_v39 = vld [vmem:[%s2540_s6 + $0x16c] sm:$0xf]  ;;  %v1943_v40 = vor.u32 %v2111_v32, %v1940_v33  ;;  %v1668_v41 = vld [vmem:[%s2540_s6 + $0x178] sm:$0xf0] }
  0x7f   : > { %1215 = vmatpush.bf16.msra.mxu2 %v1795_v10  ;;  %v1847_v10 = vor.u32 %v2087_v3, %v1844_v4  ;;  %v1796_v43 = vld [vmem:[%s2540_s6 + $0x278] sm:$0xf0]  ;;  %v2107_v44 = vld [vmem:[%s2540_s6 + $0x36c] sm:$0xf]  ;;  %v1671_v47 = vor.u32 %v2043_v39, %v1668_v41 }
  0x80   : > { %1228 = vmatpush.bf16.msra.mxu3 %v1923_v16  ;;  %v1975_v16 = vor.u32 %v2119_v6, %v1972_v7  ;;  %v1924_v45 = vld [vmem:[%s2540_s6 + $0x378] sm:$0xf0]  ;;  %v2039_v51 = vld [vmem:[%s2540_s6 + $0x14c] sm:$0xf] }
  0x81   : > { %1190 = vmatpush.bf16.msra.mxu0 %v1523_v22  ;;  %v1575_v22 = vor.u32 %v2019_v11, %v1572_v12  ;;  %v1524_v50 = vld [vmem:[%s2540_s6 + $0x58] sm:$0xf0]  ;;  %v1927_v52 = vor.u32 %v2107_v44, %v1924_v45  ;;  %v2103_v56 = vld [vmem:[%s2540_s6 + $0x34c] sm:$0xf] }
  0x82   : > { %1203 = vmatpush.bf16.msra.mxu1 %v1651_v23  ;;  %v1703_v23 = vor.u32 %v2051_v13, %v1700_v17  ;;  %v1780_v55 = vld [vmem:[%s2540_s6 + $0x258] sm:$0xf0]  ;;  %v2003_v61 = vld [vmem:[%s2540_s6 + $0x2c] sm:$0xf] }
  0x83   : > { %1216 = vmatpush.bf16.msra.mxu2 %v1779_v24  ;;  %v1831_v24 = vor.u32 %v2083_v18, %v1828_v19  ;;  %v1508_v62 = vld [vmem:[%s2540_s6 + $0x38] sm:$0xf0]  ;;  %v2035_v63 = vld [vmem:[%s2540_s6 + $0x12c] sm:$0xf] }
  0x84   : > { %1229 = vmatpush.bf16.msra.mxu3 %v1907_v28  ;;  %v1959_v28 = vor.u32 %v2115_v20, %v1956_v21  ;;  %v1636_v2 = vld [vmem:[%s2540_s6 + $0x138] sm:$0xf0]  ;;  %v2067_v3 = vld [vmem:[%s2540_s6 + $0x22c] sm:$0xf] }
  0x85   : > { %1191 = vmatpush.bf16.msra.mxu0 %v1507_v34  ;;  %v1559_v34 = vor.u32 %v2015_v25, %v1556_v26  ;;  %v1764_v4 = vld [vmem:[%s2540_s6 + $0x238] sm:$0xf0]  ;;  %v2099_v6 = vld [vmem:[%s2540_s6 + $0x32c] sm:$0xf] }
  0x86   : > { %1204 = vmatpush.bf16.msra.mxu1 %v1635_v37  ;;  %v2011_v37 = vld [vmem:[%s2540_s6 + $0x6c] sm:$0xf]  ;;  %v1892_v7 = vld [vmem:[%s2540_s6 + $0x338] sm:$0xf0] }
  0x87   : > { %1217 = vmatpush.bf16.msra.mxu2 %v1763_v38  ;;  %v1540_v38 = vld [vmem:[%s2540_s6 + $0x78] sm:$0xf0]  ;;  %v1999_v11 = vld [vmem:[%s2540_s6 + $0xc] sm:$0xf] }
  0x88   : > { %1230 = vmatpush.bf16.msra.mxu3 %v1891_v42  ;;  %v2075_v42 = vld [vmem:[%s2540_s6 + $0x26c] sm:$0xf]  ;;  %v1543_v46 = vor.u32 %v2011_v37, %v1540_v38  ;;  %v1492_v12 = vld [vmem:[%s2540_s6 + $0x18] sm:$0xf0] }
  0x89   : > { %1192 = vmatpush.bf16.msra.mxu0 %v1491_v49  ;;  %v1799_v48 = vor.u32 %v2075_v42, %v1796_v43  ;;  %v2007_v49 = vld [vmem:[%s2540_s6 + $0x4c] sm:$0xf]  ;;  %v1620_v17 = vld [vmem:[%s2540_s6 + $0x118] sm:$0xf0] }
  0x8a   : > { %1205 = vmatpush.bf16.msra.mxu1 %v1619_v53  ;;  %v1652_v53 = vld [vmem:[%s2540_s6 + $0x158] sm:$0xf0]  ;;  %v2031_v13 = vld [vmem:[%s2540_s6 + $0x10c] sm:$0xf] }
  0x8b   : > { %1218 = vmatpush.bf16.msra.mxu2 %v1747_v54  ;;  %v2071_v54 = vld [vmem:[%s2540_s6 + $0x24c] sm:$0xf]  ;;  %v1748_v19 = vld [vmem:[%s2540_s6 + $0x218] sm:$0xf0] }
  0x8c   : > { %1231 = vmatpush.bf16.msra.mxu3 %v1875_v57  ;;  %1193 = vmatmul.bf16.vlgmr.msra.gmra.mxu0 %v2642_v14  ;;  %v1908_v57 = vld [vmem:[%s2540_s6 + $0x358] sm:$0xf0]  ;;  %v2063_v18 = vld [vmem:[%s2540_s6 + $0x20c] sm:$0xf] }
  0x8d   : > { %1237 = vmatpush.bf16.msrb.mxu0 %v1607_v58  ;;  %1206 = vmatmul.bf16.vlgmr.msra.gmra.mxu1 %v2644_v15  ;;  %v1527_v58 = vor.u32 %v2007_v49, %v1524_v50  ;;  %v2095_v20 = vld [vmem:[%s2540_s6 + $0x30c] sm:$0xf]  ;;  %v1876_v21 = vld [vmem:[%s2540_s6 + $0x318] sm:$0xf0] }
  0x8e   : > { %1250 = vmatpush.bf16.msrb.mxu1 %v1735_v59  ;;  %1219 = vmatmul.bf16.vlgmr.msra.gmra.mxu2 %v2632_v1  ;;  %v1655_v59 = vor.u32 %v2039_v51, %v1652_v53  ;;  %v1879_v25 = vor.u32 %v2095_v20, %v1876_v21 }
  0x8f   : > { %1263 = vmatpush.bf16.msrb.mxu2 %v1863_v60  ;;  %1232 = vmatmul.bf16.vlgmr.msra.gmra.mxu3 %v2636_v5  ;;  %v1783_v60 = vor.u32 %v2071_v54, %v1780_v55 }
  0x90   : > { %1276 = vmatpush.bf16.msrb.mxu3 %v1991_v0  ;;  %v1911_v0 = vor.u32 %v2103_v56, %v1908_v57 }
  0x91   : > { %1238 = vmatpush.bf16.msrb.mxu0 %v1591_v8  ;;  %v1511_v8 = vor.u32 %v2003_v61, %v1508_v62 }
  0x92   : > { %1251 = vmatpush.bf16.msrb.mxu1 %v1719_v9  ;;  %v1639_v9 = vor.u32 %v2035_v63, %v1636_v2 }
  0x93   : > { %1264 = vmatpush.bf16.msrb.mxu2 %v1847_v10  ;;  %v1767_v10 = vor.u32 %v2067_v3, %v1764_v4 }
  0x94   : > { %1277 = vmatpush.bf16.msrb.mxu3 %v1975_v16  ;;  %v1895_v16 = vor.u32 %v2099_v6, %v1892_v7 }
  0x95   : > { %1239 = vmatpush.bf16.msrb.mxu0 %v1575_v22  ;;  %v1495_v22 = vor.u32 %v1999_v11, %v1492_v12 }
  0x96   : > { %1252 = vmatpush.bf16.msrb.mxu1 %v1703_v23  ;;  %v1623_v23 = vor.u32 %v2031_v13, %v1620_v17 }
  0x97   : > { %1265 = vmatpush.bf16.msrb.mxu2 %v1831_v24  ;;  %v1751_v24 = vor.u32 %v2063_v18, %v1748_v19 }
  0x98   : > { %1278 = vmatpush.bf16.msrb.mxu3 %v1959_v28 }
  0x99   : > { %1240 = vmatpush.bf16.msrb.mxu0 %v1559_v34 }
  0x9a   : > { %1253 = vmatpush.bf16.msrb.mxu1 %v1687_v35 }
  0x9b   : > { %1266 = vmatpush.bf16.msrb.mxu2 %v1815_v36 }
  0x9c   : > { %1279 = vmatpush.bf16.msrb.mxu3 %v1943_v40 }
  0x9d   : > { %1241 = vmatpush.bf16.msrb.mxu0 %v1543_v46 }
  0x9e   : > { %1254 = vmatpush.bf16.msrb.mxu1 %v1671_v47 }
  0x9f   : > { %1267 = vmatpush.bf16.msrb.mxu2 %v1799_v48 }
  0xa0   : > { %1280 = vmatpush.bf16.msrb.mxu3 %v1927_v52 }
  0xa1   : > { %1242 = vmatpush.bf16.msrb.mxu0 %v1527_v58 }
  0xa2   : > { %1255 = vmatpush.bf16.msrb.mxu1 %v1655_v59 }
  0xa3   : > { %1268 = vmatpush.bf16.msrb.mxu2 %v1783_v60 }
  0xa4   : > { %1281 = vmatpush.bf16.msrb.mxu3 %v1911_v0 }
  0xa5   : > { %1243 = vmatpush.bf16.msrb.mxu0 %v1511_v8 }
  0xa6   : > { %1256 = vmatpush.bf16.msrb.mxu1 %v1639_v9 }
  0xa7   : > { %1269 = vmatpush.bf16.msrb.mxu2 %v1767_v10 }
  0xa8   : > { %1282 = vmatpush.bf16.msrb.mxu3 %v1895_v16 }
  0xa9   : > { %1244 = vmatpush.bf16.msrb.mxu0 %v1495_v22 }
  0xaa   : > { %1257 = vmatpush.bf16.msrb.mxu1 %v1623_v23 }
  0xab   : > { %1270 = vmatpush.bf16.msrb.mxu2 %v1751_v24 }
  0xac   : > { %1283 = vmatpush.bf16.msrb.mxu3 %v1879_v25  ;;  %1245 = vmatmul.bf16.vlgmr.msrb.gmra.mxu0 %v2642_v14 }
  0xad   : > { %1258 = vmatmul.bf16.vlgmr.msrb.gmra.mxu1 %v2644_v15  ;;  %v1304_v15 = vld [vmem:[%s251_s11] sm:$0xf] }
  0xae   : > { %1271 = vmatmul.bf16.vlgmr.msrb.gmra.mxu2 %v2632_v1  ;;  %v1307_v41 = vperm.slane %v1304_v15, 1  ;;  %v1308_v2 = vperm.slane %v1304_v15, 2  ;;  %v1309_v6 = vperm.slane %v1304_v15, 3 }
  0xaf   : > { %1284 = vmatmul.bf16.vlgmr.msrb.gmra.mxu3 %v2636_v5  ;;  %v1306_v5 = vperm.slane %v1304_v15, 0 }
  0xcd   : > { %v1090_v26 = vpop.f32.mrf.mxu0 }
  0xce   : > { %v1103_v27 = vpop.f32.mrf.mxu1 }
  0xcf   : > { %v1104_v34 = vadd.f32 %v1103_v27, %v1090_v26 }
  0xd1   : > { %v1116_v28 = vpop.f32.mrf.mxu2 }
  0xd2   : > { %v1129_v29 = vpop.f32.mrf.mxu3  ;;  %v1117_v14 = vadd.f32 %v1116_v28, %v1104_v34 }
  0xd4   : > { %v1130_v38 = vadd.f32 %v1129_v29, %v1117_v14 }
  0xd5   : > { %v1092_v30 = vpop.f32.mrf.mxu0 }
  0xd6   : > { %v1105_v31 = vpop.f32.mrf.mxu1  ;;  %v1314_v45 = vadd.f32 %v1306_v5, %v1130_v38 }
  0xd9   : > { %v1118_v32 = vpop.f32.mrf.mxu2 }
  0xda   : > { %v1131_v33 = vpop.f32.mrf.mxu3 }
  0xe9   : > { %v1142_v35 = vpop.f32.mrf.mxu0 }
  0xea   : > { %v1155_v36 = vpop.f32.mrf.mxu1 }
  0xeb   : > { %v1156_v37 = vadd.f32 %v1155_v36, %v1142_v35 }
  0xf1   : > { %v1168_v1 = vpop.f32.mrf.mxu2  ;;  %v1144_v43 = vpop.f32.mrf.mxu0 }
  0xf2   : > { %v1169_v39 = vadd.f32 %v1168_v1, %v1156_v37  ;;  %v1181_v40 = vpop.f32.mrf.mxu3  ;;  %v1157_v44 = vpop.f32.mrf.mxu1 }
  0xf4   : > { %v1182_v42 = vadd.f32 %v1181_v40, %v1169_v39 }
  0xf6   : > { %v1315_v46 = vadd.f32 %v1307_v41, %v1182_v42 }
  0xf8   : > { %v1318_v47 = vpack.c.bf16 %v1315_v46, %v1314_v45 }
  0xf9   : > { %v1170_v48 = vpop.f32.mrf.mxu2 }
  0xfa   : > { %v1183_v49 = vpop.f32.mrf.mxu3  ;;  %1320 = vst [vmem:[%s2828_s28] sm:$0xff] %v1318_v47 }
 0x109   : > { %v1194_v50 = vpop.f32.mrf.mxu0 }
 0x10a   : > { %v1207_v51 = vpop.f32.mrf.mxu1 }
 0x10b   : > { %v1208_v58 = vadd.f32 %v1207_v51, %v1194_v50 }
 0x111   : > { %v1220_v52 = vpop.f32.mrf.mxu2  ;;  %v1196_v54 = vpop.f32.mrf.mxu0 }
 0x112   : > { %v1233_v53 = vpop.f32.mrf.mxu3  ;;  %v1209_v55 = vpop.f32.mrf.mxu1  ;;  %v1221_v61 = vadd.f32 %v1220_v52, %v1208_v58 }
 0x114   : > { %v1234_v0 = vadd.f32 %v1233_v53, %v1221_v61 }
 0x116   : > { %v1316_v10 = vadd.f32 %v1308_v2, %v1234_v0 }
 0x119   : > { %v1222_v56 = vpop.f32.mrf.mxu2 }
 0x11a   : > { %v1235_v57 = vpop.f32.mrf.mxu3 }
 0x129   : > { %v1246_v59 = vpop.f32.mrf.mxu0 }
 0x12a   : > { %v1259_v60 = vpop.f32.mrf.mxu1 }
 0x12b   : > { %v1260_v62 = vadd.f32 %v1259_v60, %v1246_v59 }
 0x131   : > { %v1272_v63 = vpop.f32.mrf.mxu2  ;;  %v1248_v7 = vpop.f32.mrf.mxu0 }
 0x132   : > { %v1273_v3 = vadd.f32 %v1272_v63, %v1260_v62  ;;  %v1285_v4 = vpop.f32.mrf.mxu3  ;;  %v1261_v8 = vpop.f32.mrf.mxu1 }
 0x134   : > { %v1286_v9 = vadd.f32 %v1285_v4, %v1273_v3 }
 0x136   : > { %v1317_v11 = vadd.f32 %v1309_v6, %v1286_v9 }
 0x138   : > { %v1319_v12 = vpack.c.bf16 %v1317_v11, %v1316_v10 }
 0x139   : > { %v1274_v13 = vpop.f32.mrf.mxu2 }
 0x13a   : > { %v1287_v16 = vpop.f32.mrf.mxu3  ;;  %1321 = vst [vmem:[%s2828_s28 + $0x8] sm:$0xff] %v1319_v12 }
 0x13b   : > { %2325 = shalt.err (!%p2322_p13)
}
 0x13c   : > { %2135 = dma.vmem_to_hbm [thread:$0]  (%p2500_p0), %s1339_s10, 256, %s1341_s19, %s1323_s15  }
 0x13d PF: > { %s1352_s29 = sand.u32 1, %s2364_s12   ;;  %p2149_p4 = pnand %p1469_p3, %p2504_p2 }
 0x13e   : > { %s1353_s11 = scalar_lea.sflag [#allocation5], %s1352_s29 }
 0x13f   : > { %p2150_p5 = pneg %p2149_p4 }
 0x141   : > { %2359 = dma.done.wait (%p2150_p5), %s1353_s11, 256  }
 0x142   : > { %2361 = vsyncadd (%p2150_p5), %s1353_s11, 4294967040  ;;  %s20_s17 = sadd.s32 1, %s2384_s17   ;;  %s2881_s12 = smov %s2368_s13 }
 0x143   : > { %p17_p1 = scmp.ge.s32.totalorder %s20_s17, 4   ;;  %s2882_s13 = smov %s2372_s14 }
 0x144   : > { %s2883_s14 = smov %s2462_s25  ;;  %s2884_s15 = smov %s2380_s16 }
 0x145   : > { %s2885_s16 = smov %s2887_s18  ;;  %19 = sbr.rel (!%p17_p1) target bundleno = 7 (0x7), region = 102 }
 0x14a   :  { %1359 = vsyncpa [#allocation4], 1 }
 0x14b   :  { %1361 = vsyncpa [#allocation4 + $0x1], 1 }
 0x14c   :  { %1362 = vsyncpa [#allocation7], 1 }
 0x14d   :  { %1364 = vsyncpa [#allocation7 + $0x1], 1 }
 0x14e   :  { %1365 = vsyncpa [#allocation5], 1 }
 0x14f   :  { %1367 = vsyncpa [#allocation5 + $0x1], 1 }

</bundles_post_ra>
